<compile_context>
chip_gen: v7x
topology: tpu7x:2x2x1
jax: 0.10.0
libtpu: 0.0.40
codegen_flags: <defaults>
</compile_context>

<pallas_src>
import functools

import jax
import jax.numpy as jnp
from jax.experimental import pallas as pl
from jax.experimental.pallas import tpu as pltpu


LANE = 128     # TPU lane width
SUBLANE = 8    # TPU sublane width


# ----------------------------------------------------------------------------
# Fused kernel: selector argmax + first LM step + full decode loop + sampling
# ----------------------------------------------------------------------------
def _fused_generate_kernel(x_ref, wsel_ref, bsel_ref, wlm_ref, blm_ref, noise_ref,
                           sel_ref, tok_ref, len_ref,
                           *, B, BPAD, V, CPAD, LPAD, eos, max_length):
    f32 = jnp.float32

    lane_v = jax.lax.broadcasted_iota(jnp.int32, (BPAD, V), 1)      # vocab ids per lane
    lane_l = jax.lax.broadcasted_iota(jnp.int32, (BPAD, LPAD), 1)   # step ids per lane
    lane_c = jax.lax.broadcasted_iota(jnp.int32, (BPAD, CPAD), 1)   # selector ids per lane

    x_bf = x_ref[...].astype(jnp.bfloat16)                          # (BPAD, H)

    # ---- token selector: argmax over custom-token logits -------------------
    # Padded selector columns carry a -1e30 bias so they can never win.
    sel_logits = jnp.dot(x_bf, wsel_ref[...],
                         preferred_element_type=f32) + bsel_ref[...]  # (BPAD, CPAD)
    sel_max = jnp.max(sel_logits, axis=-1, keepdims=True)
    sel_idx = jnp.min(jnp.where(sel_logits == sel_max, lane_c, jnp.int32(CPAD)),
                      axis=-1, keepdims=True)                         # (BPAD, 1)
    sel_ref[...] = jnp.broadcast_to(sel_idx, (BPAD, CPAD))            # lane-dense store

    # ---- LM-head weights stay resident in VMEM for the whole decode --------
    w_lm = wlm_ref[...]                                               # (H, V) bf16
    b_lm = blm_ref[...]                                               # (1, V) f32

    # Step-0 logits come from the last sequence position (== cls state).
    logits0 = jnp.dot(x_bf, w_lm, preferred_element_type=f32) + b_lm  # (BPAD, V) f32

    unroll = max_length if max_length <= 8 else 8                     # bounded unroll

    def step(t, carry):
        logits, toks_mat = carry

        # Gumbel-max sampling on the raw logits == multinomial(softmax(.), 1).
        # Noise is precomputed outside the kernel -> no per-step EUP work on
        # the serial chain; the per-step chain is add -> max -> select -> dot.
        pert = logits + noise_ref[t]                                  # (BPAD, V) f32
        pm = jnp.max(pert, axis=-1, keepdims=True)
        tok = jnp.min(jnp.where(pert == pm, lane_v, jnp.int32(V)),
                      axis=-1, keepdims=True)                         # (BPAD, 1) int32

        # Record token t (off the serial dependency chain; stored post-loop).
        toks_mat = jnp.where(lane_l == t, tok, toks_mat)

        # Next-step logits: one_hot(token) @ W_lm + b == exact row gather of
        # W_lm against VMEM-resident bf16 weights (zero HBM bytes per step).
        # TODO(synk): for V >> 256, replace this with B dynamic row loads from
        # wlm_ref (token indices staged through SMEM) to avoid O(B*V^2) MXU
        # work per step.
        one_hot = (lane_v == tok).astype(jnp.bfloat16)                # (BPAD, V)
        logits = jnp.dot(one_hot, w_lm, preferred_element_type=f32) + b_lm
        return logits, toks_mat

    init = (logits0, jnp.zeros((BPAD, LPAD), jnp.int32))
    _, toks_mat = jax.lax.fori_loop(0, max_length, step, init, unroll=unroll)

    tok_ref[...] = toks_mat                                           # lane-dense store

    # ---- EOS stop length, derived ONCE post-loop (no per-step XLU reduce) ---
    # Reference break: stop after the first step where ALL batch rows emit EOS.
    row = jax.lax.broadcasted_iota(jnp.int32, (BPAD, LPAD), 0)
    is_eos = jnp.logical_or(toks_mat == eos, row >= B)                # pad rows count as EOS
    col_all_eos = jnp.min(is_eos.astype(jnp.int32), axis=0, keepdims=True)  # (1, LPAD)
    step_id = jax.lax.broadcasted_iota(jnp.int32, (1, LPAD), 1)
    cand = jnp.where(jnp.logical_and(col_all_eos > 0, step_id < max_length),
                     step_id + 1, jnp.int32(max_length))
    stop_len = jnp.min(cand, axis=-1, keepdims=True)                  # (1, 1)
    len_ref[...] = jnp.broadcast_to(stop_len, (1, LANE))


# ----------------------------------------------------------------------------
# One-time parameter prep (do NOT redo per forward call)
# ----------------------------------------------------------------------------
def prepare_params(w_sel, b_sel, w_lm, b_lm):
    H, C = w_sel.shape
    V = w_lm.shape[1]
    CPAD = pl.cdiv(C, LANE) * LANE
    w_sel_p = jnp.pad(w_sel.astype(jnp.float32),
                      ((0, 0), (0, CPAD - C))).astype(jnp.bfloat16)   # (H, CPAD)
    b_sel_p = jnp.pad(jnp.reshape(b_sel, (1, C)).astype(jnp.float32),
                      ((0, 0), (0, CPAD - C)), constant_values=-1e30) # (1, CPAD)
    return {
        "w_sel": w_sel_p, "b_sel": b_sel_p,
        "w_lm": w_lm.astype(jnp.bfloat16),                            # (H, V) bf16
        "b_lm": jnp.reshape(b_lm, (1, V)).astype(jnp.float32),        # (1, V) f32
        "H": H, "C": C, "CPAD": CPAD, "V": V,
    }


# ----------------------------------------------------------------------------
# Forward pass (wrapper reproducing the PyTorch module semantics)
# ----------------------------------------------------------------------------
def explainable_token_generation_head_forward(
    llm_last_hidden_state,      # (B, S, H) float32
    params,                     # output of prepare_params (called once at init)
    *,
    eos_token_id,
    max_length,
    rng_key,
):
    B, S, H = llm_last_hidden_state.shape
    V, CPAD = params["V"], params["CPAD"]
    assert H == params["H"]
    assert V == H, "reference cat requires vocab_size == hidden_size"

    BPAD = max(SUBLANE, -(-B // SUBLANE) * SUBLANE)
    LPAD = max(LANE, -(-max_length // LANE) * LANE)

    # cls_token_hidden_state = llm_last_hidden_state[:, -1, :], padded to 8 rows
    cls = llm_last_hidden_state[:, -1, :]
    cls_pad = jnp.pad(cls, ((0, BPAD - B), (0, 0))).astype(jnp.float32)  # (BPAD, H)

    # Gumbel noise for every decode step, precomputed with the standard JAX RNG
    # (equivalent to torch.multinomial(softmax(logits), 1) in distribution).
    noise = jax.random.gumbel(rng_key, (max_length, BPAD, V), dtype=jnp.float32)

    kernel = functools.partial(
        _fused_generate_kernel,
        B=B, BPAD=BPAD, V=V, CPAD=CPAD, LPAD=LPAD,
        eos=int(eos_token_id), max_length=int(max_length))

    in_bytes = (cls_pad.size * 4 + params["w_sel"].size * 2 + params["b_sel"].size * 4
                + params["w_lm"].size * 2 + params["b_lm"].size * 4 + noise.size * 4)
    out_bytes = (BPAD * CPAD + BPAD * LPAD + LANE) * 4
    flops = 2 * BPAD * H * (CPAD + V) + 2 * int(max_length) * BPAD * V * V

    # TPU-only tuning knobs (ignored / skipped on the interpret fallback).
    on_tpu = jax.default_backend() == "tpu"
    compiler_params = None
    cost_estimate = None
    if on_tpu:
        vmem_limit = int(min(max(2 * (in_bytes + out_bytes) + (4 << 20), 32 << 20),
                             64 << 20))
        compiler_params = pltpu.CompilerParams(vmem_limit_bytes=vmem_limit)
        cost_estimate = pl.CostEstimate(flops=flops, transcendentals=0,
                                        bytes_accessed=in_bytes + out_bytes)

    # TODO(synk): on v7x the second TensorCore could be used by adding a batch
    # grid axis (dimension_semantics=("parallel",)) once B is large enough.
    sel, toks, ln = pl.pallas_call(
        kernel,
        out_shape=(jax.ShapeDtypeStruct((BPAD, CPAD), jnp.int32),
                   jax.ShapeDtypeStruct((BPAD, LPAD), jnp.int32),
                   jax.ShapeDtypeStruct((1, LANE), jnp.int32)),
        in_specs=[
            pl.BlockSpec((BPAD, H), lambda: (0, 0)),                  # cls state
            pl.BlockSpec((H, CPAD), lambda: (0, 0)),                  # selector weights
            pl.BlockSpec((1, CPAD), lambda: (0, 0)),                  # selector bias
            pl.BlockSpec((H, V), lambda: (0, 0)),                     # LM weights
            pl.BlockSpec((1, V), lambda: (0, 0)),                     # LM bias
            pl.BlockSpec((max_length, BPAD, V), lambda: (0, 0, 0)),   # Gumbel noise
        ],
        out_specs=(
            pl.BlockSpec((BPAD, CPAD), lambda: (0, 0)),
            pl.BlockSpec((BPAD, LPAD), lambda: (0, 0)),
            pl.BlockSpec((1, LANE), lambda: (0, 0)),
        ),
        compiler_params=compiler_params,
        cost_estimate=cost_estimate,
    )(cls_pad, params["w_sel"], params["b_sel"], params["w_lm"], params["b_lm"], noise)

    # Single host sync: realizes the data-dependent generated length, matching
    # the reference's variable-length output.
    stop_len = int(jax.device_get(ln[0, 0]))

    selected_token_id = sel[:B, 0]                                    # (B,)
    generated_sentence = toks[:B, :stop_len]                          # (B, T)
    # TODO(synk): tokenizer.decode / printing of the generated text is a
    # host-side string op with no Pallas/JAX equivalent and is omitted.
    return selected_token_id, generated_sentence


# ----------------------------------------------------------------------------
# Demo
# ----------------------------------------------------------------------------
if __name__ == "__main__":
    B, S = 2, 8
    H = 128                 # hidden_size
    V = 128                 # vocab_size (must equal H, see semantics note)
    C = 16                  # custom_token_size
    MAX_LENGTH = 6
    EOS = 1

    root = jax.random.PRNGKey(0)
    k_x, k_ws, k_bs, k_wl, k_bl, k_sample = jax.random.split(root, 6)

    x = jax.random.normal(k_x, (B, S, H), dtype=jnp.float32)

    # Deterministic parameter init (Linear weights stored as (in, out)).
    w_sel = jax.random.normal(k_ws, (H, C), dtype=jnp.float32) * 0.05
    b_sel = jax.random.normal(k_bs, (1, C), dtype=jnp.float32) * 0.05
    w_lm = jax.random.normal(k_wl, (H, V), dtype=jnp.float32) * 0.05
    b_lm = jax.random.normal(k_bl, (1, V), dtype=jnp.float32) * 0.05

    params = prepare_params(w_sel, b_sel, w_lm, b_lm)   # one-time init cost

    selected_token_id, generated_sentence = explainable_token_generation_head_forward(
        x, params, eos_token_id=EOS, max_length=MAX_LENGTH, rng_key=k_sample)
    jax.block_until_ready((selected_token_id, generated_sentence))

    assert selected_token_id.shape == (B,)
    assert selected_token_id.dtype == jnp.int32
    assert int(jnp.max(selected_token_id)) < C
    assert int(jnp.min(selected_token_id)) >= 0
    assert generated_sentence.shape[0] == B
    assert 1 <= generated_sentence.shape[1] <= MAX_LENGTH
    assert int(jnp.min(generated_sentence)) >= 0
    assert int(jnp.max(generated_sentence)) < V
    print("KERNEL_OK")
</pallas_src>

<mosaic_0001>
module attributes {stable_mosaic.version = 11 : i64} {
  func.func @_fused_generate_kernel(%arg0: memref<8x128xf32, #tpu.memory_space<vmem>>, %arg1: memref<128x128xbf16, #tpu.memory_space<vmem>>, %arg2: memref<1x128xf32, #tpu.memory_space<vmem>>, %arg3: memref<128x128xbf16, #tpu.memory_space<vmem>>, %arg4: memref<1x128xf32, #tpu.memory_space<vmem>>, %arg5: memref<6x8x128xf32, #tpu.memory_space<vmem>>, %arg6: memref<8x128xi32, #tpu.memory_space<vmem>>, %arg7: memref<8x128xi32, #tpu.memory_space<vmem>>, %arg8: memref<1x128xi32, #tpu.memory_space<vmem>>) attributes {dimension_semantics = [], scalar_prefetch = 0 : i64, scratch_operands = 0 : i64, tpu.core_type = #tpu.core_type<tc>} {
    %0 = tpu.iota {dimensions = array<i32: 1>} : vector<8x128xi32>
    %1 = tpu.iota {dimensions = array<i32: 1>} : vector<8x128xi32>
    %2 = tpu.iota {dimensions = array<i32: 1>} : vector<8x128xi32>
    %c0 = arith.constant 0 : index
    %c0_0 = arith.constant 0 : index
    %3 = vector.load %arg0[%c0, %c0_0] : memref<8x128xf32, #tpu.memory_space<vmem>>, vector<8x128xf32>
    %4 = arith.truncf %3 : vector<8x128xf32> to vector<8x128xbf16>
    %c0_1 = arith.constant 0 : index
    %c0_2 = arith.constant 0 : index
    %5 = vector.load %arg1[%c0_1, %c0_2] : memref<128x128xbf16, #tpu.memory_space<vmem>>, vector<128x128xbf16>
    %cst = arith.constant dense<0.000000e+00> : vector<8x128xf32>
    %6 = tpu.matmul %4, %5, %cst {dimension_numbers = #tpu.dot_dimension_numbers<[1], [0], [0], [1], [0, 0, 1, 1], [], []>} : vector<8x128xbf16>, vector<128x128xbf16>, vector<8x128xf32> -> vector<8x128xf32>
    %c0_3 = arith.constant 0 : index
    %c0_4 = arith.constant 0 : index
    %7 = vector.load %arg2[%c0_3, %c0_4] : memref<1x128xf32, #tpu.memory_space<vmem>>, vector<1x128xf32>
    %8 = vector.broadcast %7 : vector<1x128xf32> to vector<8x128xf32>
    %9 = arith.addf %6, %8 : vector<8x128xf32>
    %cst_5 = arith.constant dense<0xFF800000> : vector<8xf32>
    %10 = vector.multi_reduction <maximumf>, %9, %cst_5 [1] : vector<8x128xf32> to vector<8xf32>
    %11 = vector.shape_cast %10 : vector<8xf32> to vector<8x1xf32>
    %12 = vector.broadcast %11 : vector<8x1xf32> to vector<8x128xf32>
    %13 = arith.cmpf oeq, %9, %12 : vector<8x128xf32>
    %c128_i32 = arith.constant 128 : i32
    %14 = vector.broadcast %c128_i32 : i32 to vector<8x128xi32>
    %15 = arith.select %13, %2, %14 : vector<8x128xi1>, vector<8x128xi32>
    %cst_6 = arith.constant dense<2147483647> : vector<8xi32>
    %16 = vector.multi_reduction <minsi>, %15, %cst_6 [1] : vector<8x128xi32> to vector<8xi32>
    %17 = vector.shape_cast %16 : vector<8xi32> to vector<8x1xi32>
    %18 = vector.shape_cast %17 : vector<8x1xi32> to vector<8x1xi32>
    %19 = vector.broadcast %18 : vector<8x1xi32> to vector<8x128xi32>
    %c0_7 = arith.constant 0 : index
    %c0_8 = arith.constant 0 : index
    %20 = vector.load %arg6[%c0_7, %c0_8] : memref<8x128xi32, #tpu.memory_space<vmem>>, vector<8x128xi32>
    tpu.vector_store %arg6[%c0_7, %c0_8], %19 {strides = array<i32>} : memref<8x128xi32, #tpu.memory_space<vmem>>, vector<8x128xi32>,
    %c0_9 = arith.constant 0 : index
    %c0_10 = arith.constant 0 : index
    %21 = vector.load %arg3[%c0_9, %c0_10] : memref<128x128xbf16, #tpu.memory_space<vmem>>, vector<128x128xbf16>
    %c0_11 = arith.constant 0 : index
    %c0_12 = arith.constant 0 : index
    %22 = vector.load %arg4[%c0_11, %c0_12] : memref<1x128xf32, #tpu.memory_space<vmem>>, vector<1x128xf32>
    %cst_13 = arith.constant dense<0.000000e+00> : vector<8x128xf32>
    %23 = tpu.matmul %4, %21, %cst_13 {dimension_numbers = #tpu.dot_dimension_numbers<[1], [0], [0], [1], [0, 0, 1, 1], [], []>} : vector<8x128xbf16>, vector<128x128xbf16>, vector<8x128xf32> -> vector<8x128xf32>
    %24 = vector.broadcast %22 : vector<1x128xf32> to vector<8x128xf32>
    %25 = arith.addf %23, %24 : vector<8x128xf32>
    %c0_i32 = arith.constant 0 : i32
    %26 = vector.broadcast %c0_i32 : i32 to vector<8x128xi32>
    %c0_i32_14 = arith.constant 0 : i32
    %27 = arith.index_cast %c0_i32_14 : i32 to index
    %c0_15 = arith.constant 0 : index
    %c0_16 = arith.constant 0 : index
    %28 = vector.load %arg5[%27, %c0_15, %c0_16] : memref<6x8x128xf32, #tpu.memory_space<vmem>>, vector<1x8x128xf32>
    %29 = vector.shape_cast %28 : vector<1x8x128xf32> to vector<8x128xf32>
    %30 = arith.addf %25, %29 : vector<8x128xf32>
    %cst_17 = arith.constant dense<0xFF800000> : vector<8xf32>
    %31 = vector.multi_reduction <maximumf>, %30, %cst_17 [1] : vector<8x128xf32> to vector<8xf32>
    %32 = vector.shape_cast %31 : vector<8xf32> to vector<8x1xf32>
    %33 = vector.broadcast %32 : vector<8x1xf32> to vector<8x128xf32>
    %34 = arith.cmpf oeq, %30, %33 : vector<8x128xf32>
    %c128_i32_18 = arith.constant 128 : i32
    %35 = vector.broadcast %c128_i32_18 : i32 to vector<8x128xi32>
    %36 = arith.select %34, %0, %35 : vector<8x128xi1>, vector<8x128xi32>
    %cst_19 = arith.constant dense<2147483647> : vector<8xi32>
    %37 = vector.multi_reduction <minsi>, %36, %cst_19 [1] : vector<8x128xi32> to vector<8xi32>
    %38 = vector.shape_cast %37 : vector<8xi32> to vector<8x1xi32>
    %39 = vector.broadcast %c0_i32_14 : i32 to vector<8x128xi32>
    %40 = arith.cmpi eq, %1, %39 : vector<8x128xi32>
    %41 = vector.shape_cast %38 : vector<8x1xi32> to vector<8x1xi32>
    %42 = vector.broadcast %41 : vector<8x1xi32> to vector<8x128xi32>
    %43 = arith.select %40, %42, %26 : vector<8x128xi1>, vector<8x128xi32>
    %44 = vector.broadcast %38 : vector<8x1xi32> to vector<8x128xi32>
    %45 = arith.cmpi eq, %0, %44 : vector<8x128xi32>
    %46 = arith.extui %45 : vector<8x128xi1> to vector<8x128xi32>
    %47 = arith.sitofp %46 : vector<8x128xi32> to vector<8x128xf32>
    %48 = arith.truncf %47 : vector<8x128xf32> to vector<8x128xbf16>
    %cst_20 = arith.constant dense<0.000000e+00> : vector<8x128xf32>
    %49 = tpu.matmul %48, %21, %cst_20 {dimension_numbers = #tpu.dot_dimension_numbers<[1], [0], [0], [1], [0, 0, 1, 1], [], []>} : vector<8x128xbf16>, vector<128x128xbf16>, vector<8x128xf32> -> vector<8x128xf32>
    %50 = vector.broadcast %22 : vector<1x128xf32> to vector<8x128xf32>
    %51 = arith.addf %49, %50 : vector<8x128xf32>
    %c1_i32 = arith.constant 1 : i32
    %52 = arith.index_cast %c1_i32 : i32 to index
    %c0_21 = arith.constant 0 : index
    %c0_22 = arith.constant 0 : index
    %53 = vector.load %arg5[%52, %c0_21, %c0_22] : memref<6x8x128xf32, #tpu.memory_space<vmem>>, vector<1x8x128xf32>
    %54 = vector.shape_cast %53 : vector<1x8x128xf32> to vector<8x128xf32>
    %55 = arith.addf %51, %54 : vector<8x128xf32>
    %cst_23 = arith.constant dense<0xFF800000> : vector<8xf32>
    %56 = vector.multi_reduction <maximumf>, %55, %cst_23 [1] : vector<8x128xf32> to vector<8xf32>
    %57 = vector.shape_cast %56 : vector<8xf32> to vector<8x1xf32>
    %58 = vector.broadcast %57 : vector<8x1xf32> to vector<8x128xf32>
    %59 = arith.cmpf oeq, %55, %58 : vector<8x128xf32>
    %c128_i32_24 = arith.constant 128 : i32
    %60 = vector.broadcast %c128_i32_24 : i32 to vector<8x128xi32>
    %61 = arith.select %59, %0, %60 : vector<8x128xi1>, vector<8x128xi32>
    %cst_25 = arith.constant dense<2147483647> : vector<8xi32>
    %62 = vector.multi_reduction <minsi>, %61, %cst_25 [1] : vector<8x128xi32> to vector<8xi32>
    %63 = vector.shape_cast %62 : vector<8xi32> to vector<8x1xi32>
    %64 = vector.broadcast %c1_i32 : i32 to vector<8x128xi32>
    %65 = arith.cmpi eq, %1, %64 : vector<8x128xi32>
    %66 = vector.shape_cast %63 : vector<8x1xi32> to vector<8x1xi32>
    %67 = vector.broadcast %66 : vector<8x1xi32> to vector<8x128xi32>
    %68 = arith.select %65, %67, %43 : vector<8x128xi1>, vector<8x128xi32>
    %69 = vector.broadcast %63 : vector<8x1xi32> to vector<8x128xi32>
    %70 = arith.cmpi eq, %0, %69 : vector<8x128xi32>
    %71 = arith.extui %70 : vector<8x128xi1> to vector<8x128xi32>
    %72 = arith.sitofp %71 : vector<8x128xi32> to vector<8x128xf32>
    %73 = arith.truncf %72 : vector<8x128xf32> to vector<8x128xbf16>
    %cst_26 = arith.constant dense<0.000000e+00> : vector<8x128xf32>
    %74 = tpu.matmul %73, %21, %cst_26 {dimension_numbers = #tpu.dot_dimension_numbers<[1], [0], [0], [1], [0, 0, 1, 1], [], []>} : vector<8x128xbf16>, vector<128x128xbf16>, vector<8x128xf32> -> vector<8x128xf32>
    %75 = vector.broadcast %22 : vector<1x128xf32> to vector<8x128xf32>
    %76 = arith.addf %74, %75 : vector<8x128xf32>
    %c2_i32 = arith.constant 2 : i32
    %77 = arith.index_cast %c2_i32 : i32 to index
    %c0_27 = arith.constant 0 : index
    %c0_28 = arith.constant 0 : index
    %78 = vector.load %arg5[%77, %c0_27, %c0_28] : memref<6x8x128xf32, #tpu.memory_space<vmem>>, vector<1x8x128xf32>
    %79 = vector.shape_cast %78 : vector<1x8x128xf32> to vector<8x128xf32>
    %80 = arith.addf %76, %79 : vector<8x128xf32>
    %cst_29 = arith.constant dense<0xFF800000> : vector<8xf32>
    %81 = vector.multi_reduction <maximumf>, %80, %cst_29 [1] : vector<8x128xf32> to vector<8xf32>
    %82 = vector.shape_cast %81 : vector<8xf32> to vector<8x1xf32>
    %83 = vector.broadcast %82 : vector<8x1xf32> to vector<8x128xf32>
    %84 = arith.cmpf oeq, %80, %83 : vector<8x128xf32>
    %c128_i32_30 = arith.constant 128 : i32
    %85 = vector.broadcast %c128_i32_30 : i32 to vector<8x128xi32>
    %86 = arith.select %84, %0, %85 : vector<8x128xi1>, vector<8x128xi32>
    %cst_31 = arith.constant dense<2147483647> : vector<8xi32>
    %87 = vector.multi_reduction <minsi>, %86, %cst_31 [1] : vector<8x128xi32> to vector<8xi32>
    %88 = vector.shape_cast %87 : vector<8xi32> to vector<8x1xi32>
    %89 = vector.broadcast %c2_i32 : i32 to vector<8x128xi32>
    %90 = arith.cmpi eq, %1, %89 : vector<8x128xi32>
    %91 = vector.shape_cast %88 : vector<8x1xi32> to vector<8x1xi32>
    %92 = vector.broadcast %91 : vector<8x1xi32> to vector<8x128xi32>
    %93 = arith.select %90, %92, %68 : vector<8x128xi1>, vector<8x128xi32>
    %94 = vector.broadcast %88 : vector<8x1xi32> to vector<8x128xi32>
    %95 = arith.cmpi eq, %0, %94 : vector<8x128xi32>
    %96 = arith.extui %95 : vector<8x128xi1> to vector<8x128xi32>
    %97 = arith.sitofp %96 : vector<8x128xi32> to vector<8x128xf32>
    %98 = arith.truncf %97 : vector<8x128xf32> to vector<8x128xbf16>
    %cst_32 = arith.constant dense<0.000000e+00> : vector<8x128xf32>
    %99 = tpu.matmul %98, %21, %cst_32 {dimension_numbers = #tpu.dot_dimension_numbers<[1], [0], [0], [1], [0, 0, 1, 1], [], []>} : vector<8x128xbf16>, vector<128x128xbf16>, vector<8x128xf32> -> vector<8x128xf32>
    %100 = vector.broadcast %22 : vector<1x128xf32> to vector<8x128xf32>
    %101 = arith.addf %99, %100 : vector<8x128xf32>
    %c3_i32 = arith.constant 3 : i32
    %102 = arith.index_cast %c3_i32 : i32 to index
    %c0_33 = arith.constant 0 : index
    %c0_34 = arith.constant 0 : index
    %103 = vector.load %arg5[%102, %c0_33, %c0_34] : memref<6x8x128xf32, #tpu.memory_space<vmem>>, vector<1x8x128xf32>
    %104 = vector.shape_cast %103 : vector<1x8x128xf32> to vector<8x128xf32>
    %105 = arith.addf %101, %104 : vector<8x128xf32>
    %cst_35 = arith.constant dense<0xFF800000> : vector<8xf32>
    %106 = vector.multi_reduction <maximumf>, %105, %cst_35 [1] : vector<8x128xf32> to vector<8xf32>
    %107 = vector.shape_cast %106 : vector<8xf32> to vector<8x1xf32>
    %108 = vector.broadcast %107 : vector<8x1xf32> to vector<8x128xf32>
    %109 = arith.cmpf oeq, %105, %108 : vector<8x128xf32>
    %c128_i32_36 = arith.constant 128 : i32
    %110 = vector.broadcast %c128_i32_36 : i32 to vector<8x128xi32>
    %111 = arith.select %109, %0, %110 : vector<8x128xi1>, vector<8x128xi32>
    %cst_37 = arith.constant dense<2147483647> : vector<8xi32>
    %112 = vector.multi_reduction <minsi>, %111, %cst_37 [1] : vector<8x128xi32> to vector<8xi32>
    %113 = vector.shape_cast %112 : vector<8xi32> to vector<8x1xi32>
    %114 = vector.broadcast %c3_i32 : i32 to vector<8x128xi32>
    %115 = arith.cmpi eq, %1, %114 : vector<8x128xi32>
    %116 = vector.shape_cast %113 : vector<8x1xi32> to vector<8x1xi32>
    %117 = vector.broadcast %116 : vector<8x1xi32> to vector<8x128xi32>
    %118 = arith.select %115, %117, %93 : vector<8x128xi1>, vector<8x128xi32>
    %119 = vector.broadcast %113 : vector<8x1xi32> to vector<8x128xi32>
    %120 = arith.cmpi eq, %0, %119 : vector<8x128xi32>
    %121 = arith.extui %120 : vector<8x128xi1> to vector<8x128xi32>
    %122 = arith.sitofp %121 : vector<8x128xi32> to vector<8x128xf32>
    %123 = arith.truncf %122 : vector<8x128xf32> to vector<8x128xbf16>
    %cst_38 = arith.constant dense<0.000000e+00> : vector<8x128xf32>
    %124 = tpu.matmul %123, %21, %cst_38 {dimension_numbers = #tpu.dot_dimension_numbers<[1], [0], [0], [1], [0, 0, 1, 1], [], []>} : vector<8x128xbf16>, vector<128x128xbf16>, vector<8x128xf32> -> vector<8x128xf32>
    %125 = vector.broadcast %22 : vector<1x128xf32> to vector<8x128xf32>
    %126 = arith.addf %124, %125 : vector<8x128xf32>
    %c4_i32 = arith.constant 4 : i32
    %127 = arith.index_cast %c4_i32 : i32 to index
    %c0_39 = arith.constant 0 : index
    %c0_40 = arith.constant 0 : index
    %128 = vector.load %arg5[%127, %c0_39, %c0_40] : memref<6x8x128xf32, #tpu.memory_space<vmem>>, vector<1x8x128xf32>
    %129 = vector.shape_cast %128 : vector<1x8x128xf32> to vector<8x128xf32>
    %130 = arith.addf %126, %129 : vector<8x128xf32>
    %cst_41 = arith.constant dense<0xFF800000> : vector<8xf32>
    %131 = vector.multi_reduction <maximumf>, %130, %cst_41 [1] : vector<8x128xf32> to vector<8xf32>
    %132 = vector.shape_cast %131 : vector<8xf32> to vector<8x1xf32>
    %133 = vector.broadcast %132 : vector<8x1xf32> to vector<8x128xf32>
    %134 = arith.cmpf oeq, %130, %133 : vector<8x128xf32>
    %c128_i32_42 = arith.constant 128 : i32
    %135 = vector.broadcast %c128_i32_42 : i32 to vector<8x128xi32>
    %136 = arith.select %134, %0, %135 : vector<8x128xi1>, vector<8x128xi32>
    %cst_43 = arith.constant dense<2147483647> : vector<8xi32>
    %137 = vector.multi_reduction <minsi>, %136, %cst_43 [1] : vector<8x128xi32> to vector<8xi32>
    %138 = vector.shape_cast %137 : vector<8xi32> to vector<8x1xi32>
    %139 = vector.broadcast %c4_i32 : i32 to vector<8x128xi32>
    %140 = arith.cmpi eq, %1, %139 : vector<8x128xi32>
    %141 = vector.shape_cast %138 : vector<8x1xi32> to vector<8x1xi32>
    %142 = vector.broadcast %141 : vector<8x1xi32> to vector<8x128xi32>
    %143 = arith.select %140, %142, %118 : vector<8x128xi1>, vector<8x128xi32>
    %144 = vector.broadcast %138 : vector<8x1xi32> to vector<8x128xi32>
    %145 = arith.cmpi eq, %0, %144 : vector<8x128xi32>
    %146 = arith.extui %145 : vector<8x128xi1> to vector<8x128xi32>
    %147 = arith.sitofp %146 : vector<8x128xi32> to vector<8x128xf32>
    %148 = arith.truncf %147 : vector<8x128xf32> to vector<8x128xbf16>
    %cst_44 = arith.constant dense<0.000000e+00> : vector<8x128xf32>
    %149 = tpu.matmul %148, %21, %cst_44 {dimension_numbers = #tpu.dot_dimension_numbers<[1], [0], [0], [1], [0, 0, 1, 1], [], []>} : vector<8x128xbf16>, vector<128x128xbf16>, vector<8x128xf32> -> vector<8x128xf32>
    %150 = vector.broadcast %22 : vector<1x128xf32> to vector<8x128xf32>
    %151 = arith.addf %149, %150 : vector<8x128xf32>
    %c5_i32 = arith.constant 5 : i32
    %152 = arith.index_cast %c5_i32 : i32 to index
    %c0_45 = arith.constant 0 : index
    %c0_46 = arith.constant 0 : index
    %153 = vector.load %arg5[%152, %c0_45, %c0_46] : memref<6x8x128xf32, #tpu.memory_space<vmem>>, vector<1x8x128xf32>
    %154 = vector.shape_cast %153 : vector<1x8x128xf32> to vector<8x128xf32>
    %155 = arith.addf %151, %154 : vector<8x128xf32>
    %cst_47 = arith.constant dense<0xFF800000> : vector<8xf32>
    %156 = vector.multi_reduction <maximumf>, %155, %cst_47 [1] : vector<8x128xf32> to vector<8xf32>
    %157 = vector.shape_cast %156 : vector<8xf32> to vector<8x1xf32>
    %158 = vector.broadcast %157 : vector<8x1xf32> to vector<8x128xf32>
    %159 = arith.cmpf oeq, %155, %158 : vector<8x128xf32>
    %c128_i32_48 = arith.constant 128 : i32
    %160 = vector.broadcast %c128_i32_48 : i32 to vector<8x128xi32>
    %161 = arith.select %159, %0, %160 : vector<8x128xi1>, vector<8x128xi32>
    %cst_49 = arith.constant dense<2147483647> : vector<8xi32>
    %162 = vector.multi_reduction <minsi>, %161, %cst_49 [1] : vector<8x128xi32> to vector<8xi32>
    %163 = vector.shape_cast %162 : vector<8xi32> to vector<8x1xi32>
    %164 = vector.broadcast %c5_i32 : i32 to vector<8x128xi32>
    %165 = arith.cmpi eq, %1, %164 : vector<8x128xi32>
    %166 = vector.shape_cast %163 : vector<8x1xi32> to vector<8x1xi32>
    %167 = vector.broadcast %166 : vector<8x1xi32> to vector<8x128xi32>
    %168 = arith.select %165, %167, %143 : vector<8x128xi1>, vector<8x128xi32>
    %169 = vector.broadcast %163 : vector<8x1xi32> to vector<8x128xi32>
    %170 = arith.cmpi eq, %0, %169 : vector<8x128xi32>
    %171 = arith.extui %170 : vector<8x128xi1> to vector<8x128xi32>
    %172 = arith.sitofp %171 : vector<8x128xi32> to vector<8x128xf32>
    %173 = arith.truncf %172 : vector<8x128xf32> to vector<8x128xbf16>
    %cst_50 = arith.constant dense<0.000000e+00> : vector<8x128xf32>
    %174 = tpu.matmul %173, %21, %cst_50 {dimension_numbers = #tpu.dot_dimension_numbers<[1], [0], [0], [1], [0, 0, 1, 1], [], []>} : vector<8x128xbf16>, vector<128x128xbf16>, vector<8x128xf32> -> vector<8x128xf32>
    %175 = vector.broadcast %22 : vector<1x128xf32> to vector<8x128xf32>
    %176 = arith.addf %174, %175 : vector<8x128xf32>
    %c6_i32 = arith.constant 6 : i32
    %c0_51 = arith.constant 0 : index
    %c0_52 = arith.constant 0 : index
    %177 = vector.load %arg7[%c0_51, %c0_52] : memref<8x128xi32, #tpu.memory_space<vmem>>, vector<8x128xi32>
    tpu.vector_store %arg7[%c0_51, %c0_52], %168 {strides = array<i32>} : memref<8x128xi32, #tpu.memory_space<vmem>>, vector<8x128xi32>,
    %178 = tpu.iota {dimensions = array<i32: 0>} : vector<8x128xi32>
    %c1_i32_53 = arith.constant 1 : i32
    %179 = vector.broadcast %c1_i32_53 : i32 to vector<8x128xi32>
    %180 = arith.cmpi eq, %168, %179 : vector<8x128xi32>
    %c2_i32_54 = arith.constant 2 : i32
    %181 = vector.broadcast %c2_i32_54 : i32 to vector<8x128xi32>
    %182 = arith.cmpi sge, %178, %181 : vector<8x128xi32>
    %183 = arith.ori %180, %182 : vector<8x128xi1>
    %184 = arith.extui %183 : vector<8x128xi1> to vector<8x128xi32>
    %cst_55 = arith.constant dense<2147483647> : vector<128xi32>
    %185 = vector.multi_reduction <minsi>, %184, %cst_55 [0] : vector<8x128xi32> to vector<128xi32>
    %186 = vector.shape_cast %185 : vector<128xi32> to vector<1x128xi32>
    %187 = tpu.iota {dimensions = array<i32: 1>} : vector<1x128xi32>
    %c0_i32_56 = arith.constant 0 : i32
    %188 = vector.broadcast %c0_i32_56 : i32 to vector<1x128xi32>
    %189 = arith.cmpi sgt, %186, %188 : vector<1x128xi32>
    %c6_i32_57 = arith.constant 6 : i32
    %190 = vector.broadcast %c6_i32_57 : i32 to vector<1x128xi32>
    %191 = arith.cmpi slt, %187, %190 : vector<1x128xi32>
    %192 = arith.andi %189, %191 : vector<1x128xi1>
    %c1_i32_58 = arith.constant 1 : i32
    %193 = vector.broadcast %c1_i32_58 : i32 to vector<1x128xi32>
    %194 = arith.addi %187, %193 : vector<1x128xi32>
    %c6_i32_59 = arith.constant 6 : i32
    %195 = vector.broadcast %c6_i32_59 : i32 to vector<1x128xi32>
    %196 = arith.select %192, %194, %195 : vector<1x128xi1>, vector<1x128xi32>
    %cst_60 = arith.constant dense<2147483647> : vector<1xi32>
    %197 = vector.multi_reduction <minsi>, %196, %cst_60 [1] : vector<1x128xi32> to vector<1xi32>
    %198 = vector.shape_cast %197 : vector<1xi32> to vector<1x1xi32>
    %199 = vector.shape_cast %198 : vector<1x1xi32> to vector<1x1xi32>
    %200 = vector.broadcast %199 : vector<1x1xi32> to vector<1x128xi32>
    %c0_61 = arith.constant 0 : index
    %c0_62 = arith.constant 0 : index
    %201 = vector.load %arg8[%c0_61, %c0_62] : memref<1x128xi32, #tpu.memory_space<vmem>>, vector<1x128xi32>
    tpu.vector_store %arg8[%c0_61, %c0_62], %200 {strides = array<i32>} : memref<1x128xi32, #tpu.memory_space<vmem>>, vector<1x128xi32>,
    return
  }
}

</mosaic_0001>

<bundles_post_ra>
// kernel: tpu_custom_call.1
= control target key start
LH: loop header
LB: loop body
LE: loop exit
PB: predicated region body
PF: predicated region fallthrough
CT: control target
= control target key end

     0   :  { %14 = vsyncpa [#allocation3], 0  ;;  %s1525_s0 = inlined_call_operand.hbm [shape: f32[8,128], index: 0, kind: input, shape index: {}]   ;;  %s1526_s1 = inlined_call_operand.hbm [shape: bf16[128,128], index: 1, kind: input, shape index: {}]   ;;  %s1527_s2 = inlined_call_operand.vmem [shape: f32[1,128], index: 2, kind: input, shape index: {}]   ;;  %s1528_s3 = inlined_call_operand.hbm [shape: bf16[128,128], index: 3, kind: input, shape index: {}]   ;;  %s1529_s4 = inlined_call_operand.vmem [shape: f32[1,128], index: 4, kind: input, shape index: {}]   ;;  %s1530_s5 = inlined_call_operand.hbm [shape: f32[6,8,128], index: 5, kind: input, shape index: {}]   ;;  %s1531_s6 = inlined_call_operand.hbm [shape: s32[8,128], index: 6, kind: output, shape index: {0}]   ;;  %s1532_s7 = inlined_call_operand.hbm [shape: s32[8,128], index: 7, kind: output, shape index: {1}]   ;;  %s1533_s8 = inlined_call_operand.hbm [shape: s32[1,128], index: 8, kind: output, shape index: {2}]  }
   0x1   :  { %15 = vsyncpa [#allocation6], 0 }
   0x2   :  { %16 = vsyncpa [#allocation9], 0 }
   0x3   :  { %17 = vsyncpa [#allocation4], 0 }
   0x4   :  { %18 = vsyncpa [#allocation12], 0  ;;  %s1195_s27 = smov [#allocation5]   ;;  %s1031_s9 = scalar_lea.hbm %s1526_s1, 1024 }
   0x5   :  { %s34_s28 = sshll.u32 %s1195_s27, 4  ;;  %p1032_p0 = scmp.ne.s32.totalorder %s1526_s1, %s1031_s9  ;;  %s35_s28 = int_to_ptr.vmem [resolvable:$true] %s34_s28 }
   0x6   :  { %p1035_p1 = scmp.lt.u32.totalorder %s1031_s9, %s1526_s1 }
   0x8   :  { %p1037_p2 = pnand %p1035_p1, %p1032_p0 }
   0xa   :  { %1040 = shalt.err (!%p1037_p2)
}
   0xb   :  { %s1041_s14 = scalar_lea.vmem %s35_s28, 1024  ;;  %p1046_p4 = scmp.lt.s32.totalorder %s35_s28, %s35_s28 }
   0xc   :  { %p1042_p3 = scmp.ne.s32.totalorder %s35_s28, %s1041_s14  ;;  %p1047_p5 = scmp.lt.s32.totalorder %s1041_s14, %s1041_s14 }
   0xe   :  { %p1048_p6 = por %p1047_p5, %p1046_p4 }
  0x10   :  { %p1049_p7 = pnand %p1048_p6, %p1042_p3 }
  0x12   :  { %1052 = shalt.err (!%p1049_p7)
}
  0x13   :  { %s1196_s15 = smov 64   ;;  %s1197_s16 = smov 4  }
  0x14   :  { %40 = dma.hbm_to_vmem [thread:$0]  %s1526_s1, 1024, %s35_s28, [#allocation6], %s1196_s15, %s1196_s15, %s1197_s16  }
  0x15   :  { %s1198_s19 = smov [#allocation2]   ;;  %s1199_s21 = smov [#allocation7]  }
  0x16   :  { %s25_s20 = sshll.u32 %s1198_s19, 4  ;;  %s48_s22 = sshll.u32 %s1199_s21, 4  ;;  %s26_s20 = int_to_ptr.vmem [resolvable:$true] %s25_s20  ;;  %s49_s22 = int_to_ptr.vmem [resolvable:$true] %s48_s22 }
  0x17   :  { %s1053_s25 = scalar_lea.hbm %s1525_s0, 128 }
  0x18   :  { %p1054_p8 = scmp.ne.s32.totalorder %s1525_s0, %s1053_s25  ;;  %p1057_p9 = scmp.lt.u32.totalorder %s1053_s25, %s1525_s0 }
  0x1a   :  { %p1059_p10 = pnand %p1057_p9, %p1054_p8 }
  0x1c   :  { %1062 = shalt.err (!%p1059_p10)
}
  0x1d   :  { %s1063_s1 = scalar_lea.vmem %s26_s20, 128  ;;  %p1068_p12 = scmp.lt.s32.totalorder %s26_s20, %s26_s20 }
  0x1e   :  { %p1064_p11 = scmp.ne.s32.totalorder %s26_s20, %s1063_s1  ;;  %p1069_p13 = scmp.lt.s32.totalorder %s1063_s1, %s1063_s1 }
  0x20   :  { %p1070_p0 = por %p1069_p13, %p1068_p12 }
  0x22   :  { %p1071_p1 = pnand %p1070_p0, %p1064_p11 }
  0x24   :  { %1074 = shalt.err (!%p1071_p1)
}
  0x25   :  { %28 = dma.hbm_to_vmem [thread:$0]  %s1525_s0, 128, %s26_s20, [#allocation3]  }
  0x26   :  { %s1075_s12 = scalar_lea.hbm %s1528_s3, 1024 }
  0x27   :  { %p1076_p2 = scmp.ne.s32.totalorder %s1528_s3, %s1075_s12  ;;  %p1079_p3 = scmp.lt.u32.totalorder %s1075_s12, %s1528_s3 }
  0x29   :  { %p1081_p4 = pnand %p1079_p3, %p1076_p2 }
  0x2b   :  { %1084 = shalt.err (!%p1081_p4)
}
  0x2c   :  { %s1085_s19 = scalar_lea.vmem %s49_s22, 1024  ;;  %p1090_p6 = scmp.lt.s32.totalorder %s49_s22, %s49_s22 }
  0x2d   :  { %p1086_p5 = scmp.ne.s32.totalorder %s49_s22, %s1085_s19  ;;  %p1091_p7 = scmp.lt.s32.totalorder %s1085_s19, %s1085_s19 }
  0x2f   :  { %p1092_p8 = por %p1091_p7, %p1090_p6 }
  0x31   :  { %p1093_p9 = pnand %p1092_p8, %p1086_p5 }
  0x33   :  { %1096 = shalt.err (!%p1093_p9)
}
  0x34   :  { %54 = dma.hbm_to_vmem [thread:$0]  %s1528_s3, 1024, %s49_s22, [#allocation6], %s1196_s15, %s1196_s15, %s1197_s16  }
  0x35   :  { %s1200_s21 = smov [#allocation8]   ;;  %s1097_s26 = scalar_lea.hbm %s1530_s5, 768 }
  0x36   :  { %s62_s23 = sshll.u32 %s1200_s21, 4  ;;  %p1098_p10 = scmp.ne.s32.totalorder %s1530_s5, %s1097_s26  ;;  %s63_s23 = int_to_ptr.vmem [resolvable:$true] %s62_s23 }
  0x37   :  { %p1101_p11 = scmp.lt.u32.totalorder %s1097_s26, %s1530_s5 }
  0x39   :  { %p1103_p12 = pnand %p1101_p11, %p1098_p10 }
  0x3b   :  { %1106 = shalt.err (!%p1103_p12)
}
  0x3c   :  { %s1107_s28 = scalar_lea.vmem %s63_s23, 768  ;;  %p1112_p0 = scmp.lt.s32.totalorder %s63_s23, %s63_s23 }
  0x3d   :  { %p1108_p13 = scmp.ne.s32.totalorder %s63_s23, %s1107_s28  ;;  %p1113_p1 = scmp.lt.s32.totalorder %s1107_s28, %s1107_s28 }
  0x3f   :  { %p1114_p2 = por %p1113_p1, %p1112_p0 }
  0x41   :  { %p1115_p3 = pnand %p1114_p2, %p1108_p13 }
  0x43   :  { %1118 = shalt.err (!%p1115_p3)
}
  0x44   :  { %s1201_s3 = smov 128   ;;  %s1202_s15 = smov 8  }
  0x45   :  { %68 = dma.hbm_to_vmem [thread:$0]  %s1530_s5, 768, %s63_s23, [#allocation9], %s1201_s3, %s1201_s3, %s1202_s15  }
  0x46   :  { %1185 = dma.done.wait [#allocation3], 128  }
  0x47   :  { %1186 = vsyncadd [#allocation3], 4294967168 }
  0x48   :  { %1187 = dma.done.wait [#allocation6], 2048  }
  0x49   :  { %1188 = vsyncadd [#allocation6], 4294965248 }
  0x4a   :  { %1189 = dma.done.wait [#allocation9], 768  }
  0x4b   :  { %1190 = vsyncadd [#allocation9], 4294966528  ;;  %v1203_v0 = vmov 0.0   ;;  %vm1204_vm0 = vmmov 0   ;;  %v1315_v1 = vld [vmem:[#allocation7] sm:$0xff]   ;;  %v1318_v2 = vld [vmem:[#allocation7 + $0x8] sm:$0xff]   ;;  %v82_v19 = vlaneseq }
  0x4c   :  { %880 = vmatprep.subr.bf16.mxu1 %v1203_v0  ;;  %896 = vmatprep.mubr.msk.bf16.mxu1 %vm1204_vm0, %v1203_v0  ;;  %v1322_v3 = vld [vmem:[#allocation7 + $0x10] sm:$0xff]   ;;  %v1325_v4 = vld [vmem:[#allocation7 + $0x18] sm:$0xff]   ;;  %v1330_v5 = vld [vmem:[#allocation7 + $0x20] sm:$0xff]   ;;  %v1205_v46 = vmov 1.0|1.0   ;;  %s1208_s12 = smov [#allocation10]  }
  0x4d   :  { %860 = vmatprep.subr.bf16.mxu0 %v1203_v0  ;;  %876 = vmatprep.mubr.msk.bf16.mxu0 %vm1204_vm0, %v1203_v0  ;;  %v1334_v6 = vld [vmem:[#allocation7 + $0x28] sm:$0xff]   ;;  %v1338_v7 = vld [vmem:[#allocation7 + $0x30] sm:$0xff]   ;;  %v1342_v8 = vld [vmem:[#allocation7 + $0x38] sm:$0xff]   ;;  %v1372_v20 = vand.u32 127, %v82_v19  ;;  %s726_s13 = sshll.u32 %s1208_s12, 4  ;;  %s727_s13 = int_to_ptr.vmem [resolvable:$true] %s726_s13 }
  0x4e   :  { %881 = vmatpush3.bf16.msra.mxu1 %v1315_v1  ;;  %v84_v9 = vld [vmem:[#allocation2] sm:$0xff]  ;;  %v327_v13 = vld [vmem:[#allocation8] sm:$0xff]  ;;  %v1024_v26 = vld [vmem:[#allocation5 + $0x8] sm:$0xff]  }
  0x4f   :  { %882 = vmatprep.subr.bf16.mxu1 %v1203_v0  ;;  %v85_v10 = vpack.c.bf16 %v84_v9, %v84_v9  ;;  %v1368_v11 = vld [vmem:[%s1529_s4] ss:$0 sm:$0xff]  ;;  %v1023_v25 = vld [vmem:[#allocation5] sm:$0xff]   ;;  %v1025_v27 = vld [vmem:[#allocation5 + $0x10] sm:$0xff]   ;;  %vm347_vm7 = vcmp.eq.s32.totalorder %v1372_v20, 0  ;;  %vm414_vm8 = vcmp.eq.s32.totalorder %v1372_v20, 1 }
  0x50   :  { %861 = vmatpush3.bf16.msra.mxu0 %v1023_v25  ;;  %v1026_v28 = vld [vmem:[#allocation5 + $0x18] sm:$0xff]   ;;  %v1027_v29 = vld [vmem:[#allocation5 + $0x20] sm:$0xff]   ;;  %v1028_v30 = vld [vmem:[#allocation5 + $0x28] sm:$0xff]   ;;  %vm481_vm13 = vcmp.eq.s32.totalorder %v1372_v20, 2 }
  0x51   :  { %862 = vmatprep.subr.bf16.mxu0 %v1203_v0  ;;  %v1029_v31 = vld [vmem:[#allocation5 + $0x30] sm:$0xff]   ;;  %v1030_v32 = vld [vmem:[#allocation5 + $0x38] sm:$0xff]   ;;  %v394_v48 = vld [vmem:[#allocation8 + $0x8] sm:$0xff] }
  0x52   :  { %883 = vmatpush3.bf16.msra.mxu1 %v1318_v2 }
  0x53   :  { %884 = vmatprep.subr.bf16.mxu1 %v1203_v0 }
  0x54   :  { %863 = vmatpush3.bf16.msra.mxu0 %v1024_v26 }
  0x55   :  { %864 = vmatprep.subr.bf16.mxu0 %v1203_v0 }
  0x56   :  { %885 = vmatpush3.bf16.msra.mxu1 %v1322_v3 }
  0x57   :  { %886 = vmatprep.subr.bf16.mxu1 %v1203_v0 }
  0x58   :  { %865 = vmatpush3.bf16.msra.mxu0 %v1025_v27 }
  0x59   :  { %866 = vmatprep.subr.bf16.mxu0 %v1203_v0 }
  0x5a   :  { %887 = vmatpush3.bf16.msra.mxu1 %v1325_v4 }
  0x5b   :  { %888 = vmatprep.subr.bf16.mxu1 %v1203_v0 }
  0x5c   :  { %867 = vmatpush3.bf16.msra.mxu0 %v1026_v28 }
  0x5d   :  { %868 = vmatprep.subr.bf16.mxu0 %v1203_v0 }
  0x5e   :  { %889 = vmatpush3.bf16.msra.mxu1 %v1330_v5 }
  0x5f   :  { %890 = vmatprep.subr.bf16.mxu1 %v1203_v0 }
  0x60   :  { %869 = vmatpush3.bf16.msra.mxu0 %v1027_v29 }
  0x61   :  { %870 = vmatprep.subr.bf16.mxu0 %v1203_v0 }
  0x62   :  { %891 = vmatpush3.bf16.msra.mxu1 %v1334_v6 }
  0x63   :  { %892 = vmatprep.subr.bf16.mxu1 %v1203_v0 }
  0x64   :  { %871 = vmatpush3.bf16.msra.mxu0 %v1028_v30 }
  0x65   :  { %872 = vmatprep.subr.bf16.mxu0 %v1203_v0 }
  0x66   :  { %893 = vmatpush3.bf16.msra.mxu1 %v1338_v7 }
  0x67   :  { %894 = vmatprep.subr.bf16.mxu1 %v1203_v0 }
  0x68   :  { %873 = vmatpush3.bf16.msra.mxu0 %v1029_v31 }
  0x69   :  { %874 = vmatprep.subr.bf16.mxu0 %v1203_v0 }
  0x6a   :  { %895 = vmatpush3.bf16.msra.mxu1 %v1342_v8 }
  0x6b   :  { %920 = vmatprep.subr.bf16.mxu1 %v1203_v0 }
  0x6c   :  { %875 = vmatpush3.bf16.msra.mxu0 %v1030_v32 }
  0x6d   :  { %897 = vmatmul.mubr.bf16.vlgmr.msra.gmra.mrb[0].mxu1 %v85_v10  ;;  %900 = vmatprep.subr.bf16.mxu0 %v1203_v0 }
  0x6e   :  { %921 = vmatpush3.bf16.msra.mxu1 %v1315_v1  ;;  %936 = vmatprep.mubr.msk.bf16.mxu1 %vm1204_vm0, %v1203_v0 }
  0x6f   :  { %922 = vmatprep.subr.bf16.mxu1 %v1203_v0  ;;  %877 = vmatmul.mubr.bf16.vlgmr.msra.gmra.mrb[0].mxu0 %v85_v10 }
  0x70   :  { %901 = vmatpush3.bf16.msra.mxu0 %v1315_v1  ;;  %916 = vmatprep.mubr.msk.bf16.mxu0 %vm1204_vm0, %v1203_v0 }
  0x71   :  { %902 = vmatprep.subr.bf16.mxu0 %v1203_v0 }
  0x72   :  { %923 = vmatpush3.bf16.msra.mxu1 %v1318_v2 }
  0x73   :  { %924 = vmatprep.subr.bf16.mxu1 %v1203_v0 }
  0x74   :  { %903 = vmatpush3.bf16.msra.mxu0 %v1318_v2 }
  0x75   :  { %904 = vmatprep.subr.bf16.mxu0 %v1203_v0 }
  0x76   :  { %925 = vmatpush3.bf16.msra.mxu1 %v1322_v3 }
  0x77   :  { %926 = vmatprep.subr.bf16.mxu1 %v1203_v0 }
  0x78   :  { %905 = vmatpush3.bf16.msra.mxu0 %v1322_v3 }
  0x79   :  { %906 = vmatprep.subr.bf16.mxu0 %v1203_v0 }
  0x7a   :  { %927 = vmatpush3.bf16.msra.mxu1 %v1325_v4 }
  0x7b   :  { %928 = vmatprep.subr.bf16.mxu1 %v1203_v0 }
  0x7c   :  { %907 = vmatpush3.bf16.msra.mxu0 %v1325_v4 }
  0x7d   :  { %908 = vmatprep.subr.bf16.mxu0 %v1203_v0 }
  0x7e   :  { %929 = vmatpush3.bf16.msra.mxu1 %v1330_v5 }
  0x7f   :  { %930 = vmatprep.subr.bf16.mxu1 %v1203_v0 }
  0x80   :  { %909 = vmatpush3.bf16.msra.mxu0 %v1330_v5 }
  0x81   :  { %910 = vmatprep.subr.bf16.mxu0 %v1203_v0 }
  0x82   :  { %931 = vmatpush3.bf16.msra.mxu1 %v1334_v6 }
  0x83   :  { %932 = vmatprep.subr.bf16.mxu1 %v1203_v0 }
  0x84   :  { %911 = vmatpush3.bf16.msra.mxu0 %v1334_v6 }
  0x85   :  { %912 = vmatprep.subr.bf16.mxu0 %v1203_v0 }
  0x86   :  { %933 = vmatpush3.bf16.msra.mxu1 %v1338_v7 }
  0x87   :  { %934 = vmatprep.subr.bf16.mxu1 %v1203_v0 }
  0x88   :  { %913 = vmatpush3.bf16.msra.mxu0 %v1338_v7 }
  0x89   :  { %914 = vmatprep.subr.bf16.mxu0 %v1203_v0 }
  0x8a   :  { %935 = vmatpush3.bf16.msra.mxu1 %v1342_v8 }
  0x8b   :  { %960 = vmatprep.subr.bf16.mxu1 %v1203_v0 }
  0x8c   :  { %915 = vmatpush3.bf16.msra.mxu0 %v1342_v8 }
  0x8d   :  { %940 = vmatprep.subr.bf16.mxu0 %v1203_v0 }
 0x140   :  { %v321_v12 = vpop.f32.mrb[0].mxu1 }
 0x141   :  { %v322_v14 = vadd.f32 %v1368_v11, %v321_v12  ;;  %v898_v15 = vpop.f32.mrb[1].mxu1 }
 0x142   :  { %v324_v16 = vpop.f32.mrb[2].mxu1  ;;  %v1401_v37 = vpop.f32.mrb[0].mxu0 }
 0x143   :  { %v899_v17 = vpop.f32.mrb[3].mxu1  ;;  %v328_v18 = vadd.f32 %v327_v13, %v322_v14  ;;  %v878_v38 = vpop.f32.mrb[1].mxu0  ;;  %v461_v16 = vld [vmem:[#allocation8 + $0x10] sm:$0xff] }
 0x144   :  { %v194_v39 = vpop.f32.mrb[2].mxu0 }
 0x145   :  { %329 = vmax.xlane.f32.xlu0 %v328_v18  ;;  %v879_v40 = vpop.f32.mrb[3].mxu0 }
 0x1d2   :  { %v330_v21 = vpop.xlane.xlu0 %329 }
 0x1d3   :  { %vm331_vm1 = vcmp.eq.f32.partialorder %v328_v18, %v330_v21 }
 0x1d4   :  { %v332_v22 = vsel %vm331_vm1, %v1372_v20, 128 }
 0x1d5   :  { %v334_v23 = vshra.s32 %v332_v22, 16  ;;  %v333_v33 = vand.u32 65535, %v332_v22 }
 0x1d7   :  { %v336_v24 = vcvt.s32.f32 %v334_v23  ;;  %v335_v35 = vcvt.s32.f32 %v333_v33 }
 0x1d9   :  { %337 = vmin.xlane.f32.xlu0 %v336_v24 }
 0x266   :  { %v338_v34 = vpop.xlane.xlu0 %337 }
 0x267   :  { %vm339_vm2 = vcmp.eq.f32.partialorder %v336_v24, %v338_v34  ;;  %v344_v41 = vcvt.f32.s32 %v338_v34 }
 0x268   :  { %v340_v36 = vsel %vm339_vm2, %v335_v35, inf  ;;  %vm548_vm2 = vcmp.eq.s32.totalorder %v1372_v20, 3 }
 0x269   :  { %341 = vmin.xlane.f32.xlu1 %v340_v36  ;;  %v345_v43 = vshll.u32 %v344_v41, 16 }
 0x2f6   :  { %v342_v42 = vpop.xlane.xlu1 %341 }
 0x2f7   :  { %v343_v44 = vcvt.f32.s32 %v342_v42 }
 0x2f9   :  { %v346_v45 = vadd.s32 %v345_v43, %v343_v44 }
 0x2fb   :  { %vm349_vm3 = vcmp.eq.s32.totalorder %v1372_v20, %v346_v45  ;;  %v348_v13 = vsel %vm347_vm7, %v346_v45, 0  ;;  %vm615_vm7 = vcmp.eq.s32.totalorder %v1372_v20, 4 }
 0x2fc   :  { %vm783_vm4 = vmpackc.low %vm349_vm3, %vm349_vm3 }
 0x2fd   :  { %917 = vmatmul.mubr.msk.bf16.vlgmr.msra.gmra.mrb[4].mxu0 %vm783_vm4, %v1205_v46 }
 0x2fe   :  { %941 = vmatpush3.bf16.msra.mxu0 %v1315_v1  ;;  %956 = vmatprep.mubr.msk.bf16.mxu0 %vm1204_vm0, %v1203_v0 }
 0x2ff   :  { %942 = vmatprep.subr.bf16.mxu0 %v1203_v0 }
 0x302   :  { %943 = vmatpush3.bf16.msra.mxu0 %v1318_v2 }
 0x303   :  { %944 = vmatprep.subr.bf16.mxu0 %v1203_v0 }
 0x306   :  { %945 = vmatpush3.bf16.msra.mxu0 %v1322_v3 }
 0x307   :  { %946 = vmatprep.subr.bf16.mxu0 %v1203_v0 }
 0x30a   :  { %947 = vmatpush3.bf16.msra.mxu0 %v1325_v4 }
 0x30b   :  { %948 = vmatprep.subr.bf16.mxu0 %v1203_v0 }
 0x30e   :  { %949 = vmatpush3.bf16.msra.mxu0 %v1330_v5 }
 0x30f   :  { %950 = vmatprep.subr.bf16.mxu0 %v1203_v0 }
 0x312   :  { %951 = vmatpush3.bf16.msra.mxu0 %v1334_v6 }
 0x313   :  { %952 = vmatprep.subr.bf16.mxu0 %v1203_v0 }
 0x316   :  { %953 = vmatpush3.bf16.msra.mxu0 %v1338_v7 }
 0x317   :  { %954 = vmatprep.subr.bf16.mxu0 %v1203_v0 }
 0x31a   :  { %955 = vmatpush3.bf16.msra.mxu0 %v1342_v8 }
 0x31b   :  { %980 = vmatprep.subr.bf16.mxu0 %v1203_v0 }
 0x3d0   :  { %v387_v47 = vpop.f32.mrb[4].mxu0 }
 0x3d1   :  { %v388_v49 = vadd.f32 %v1368_v11, %v387_v47  ;;  %v918_v50 = vpop.f32.mrb[5].mxu0 }
 0x3d2   :  { %v390_v51 = vpop.f32.mrb[6].mxu0 }
 0x3d3   :  { %v919_v52 = vpop.f32.mrb[7].mxu0  ;;  %v395_v53 = vadd.f32 %v394_v48, %v388_v49 }
 0x3d5   :  { %396 = vmax.xlane.f32.xlu1 %v395_v53 }
 0x462   :  { %v397_v54 = vpop.xlane.xlu1 %396 }
 0x463   :  { %vm398_vm5 = vcmp.eq.f32.partialorder %v395_v53, %v397_v54  ;;  %v595_v53 = vld [vmem:[#allocation8 + $0x20] sm:$0xff] }
 0x464   :  { %v399_v55 = vsel %vm398_vm5, %v1372_v20, 128 }
 0x465   :  { %v401_v56 = vshra.s32 %v399_v55, 16  ;;  %v400_v58 = vand.u32 65535, %v399_v55 }
 0x467   :  { %v403_v57 = vcvt.s32.f32 %v401_v56  ;;  %v402_v60 = vcvt.s32.f32 %v400_v58 }
 0x469   :  { %404 = vmin.xlane.f32.xlu0 %v403_v57 }
 0x4f6   :  { %v405_v59 = vpop.xlane.xlu0 %404 }
 0x4f7   :  { %vm406_vm6 = vcmp.eq.f32.partialorder %v403_v57, %v405_v59  ;;  %v411_v62 = vcvt.f32.s32 %v405_v59 }
 0x4f8   :  { %v407_v61 = vsel %vm406_vm6, %v402_v60, inf }
 0x4f9   :  { %408 = vmin.xlane.f32.xlu1 %v407_v61  ;;  %v412_v9 = vshll.u32 %v411_v62, 16 }
 0x586   :  { %v409_v63 = vpop.xlane.xlu1 %408 }
 0x587   :  { %v410_v10 = vcvt.f32.s32 %v409_v63 }
 0x589   :  { %v413_v12 = vadd.s32 %v412_v9, %v410_v10 }
 0x58b   :  { %v415_v14 = vsel %vm414_vm8, %v413_v12, %v348_v13  ;;  %vm416_vm9 = vcmp.eq.s32.totalorder %v1372_v20, %v413_v12 }
 0x58c   :  { %vm786_vm10 = vmpackc.low %vm416_vm9, %vm416_vm9 }
 0x58d   :  { %937 = vmatmul.mubr.msk.bf16.vlgmr.msra.gmra.mrb[4].mxu1 %vm786_vm10, %v1205_v46 }
 0x58e   :  { %961 = vmatpush3.bf16.msra.mxu1 %v1315_v1  ;;  %976 = vmatprep.mubr.msk.bf16.mxu1 %vm1204_vm0, %v1203_v0 }
 0x58f   :  { %962 = vmatprep.subr.bf16.mxu1 %v1203_v0 }
 0x592   :  { %963 = vmatpush3.bf16.msra.mxu1 %v1318_v2 }
 0x593   :  { %964 = vmatprep.subr.bf16.mxu1 %v1203_v0 }
 0x596   :  { %965 = vmatpush3.bf16.msra.mxu1 %v1322_v3 }
 0x597   :  { %966 = vmatprep.subr.bf16.mxu1 %v1203_v0 }
 0x59a   :  { %967 = vmatpush3.bf16.msra.mxu1 %v1325_v4 }
 0x59b   :  { %968 = vmatprep.subr.bf16.mxu1 %v1203_v0 }
 0x59e   :  { %969 = vmatpush3.bf16.msra.mxu1 %v1330_v5 }
 0x59f   :  { %970 = vmatprep.subr.bf16.mxu1 %v1203_v0 }
 0x5a2   :  { %971 = vmatpush3.bf16.msra.mxu1 %v1334_v6 }
 0x5a3   :  { %972 = vmatprep.subr.bf16.mxu1 %v1203_v0 }
 0x5a6   :  { %973 = vmatpush3.bf16.msra.mxu1 %v1338_v7 }
 0x5a7   :  { %974 = vmatprep.subr.bf16.mxu1 %v1203_v0 }
 0x5aa   :  { %975 = vmatpush3.bf16.msra.mxu1 %v1342_v8 }
 0x660   :  { %v454_v15 = vpop.f32.mrb[4].mxu1 }
 0x661   :  { %v455_v17 = vadd.f32 %v1368_v11, %v454_v15  ;;  %v938_v18 = vpop.f32.mrb[5].mxu1 }
 0x662   :  { %v457_v21 = vpop.f32.mrb[6].mxu1 }
 0x663   :  { %v939_v22 = vpop.f32.mrb[7].mxu1  ;;  %v462_v23 = vadd.f32 %v461_v16, %v455_v17 }
 0x664   :  { %v662_v22 = vld [vmem:[#allocation8 + $0x28] sm:$0xff] }
 0x665   :  { %463 = vmax.xlane.f32.xlu0 %v462_v23 }
 0x6f2   :  { %v464_v24 = vpop.xlane.xlu0 %463 }
 0x6f3   :  { %vm465_vm11 = vcmp.eq.f32.partialorder %v462_v23, %v464_v24 }
 0x6f4   :  { %v466_v25 = vsel %vm465_vm11, %v1372_v20, 128 }
 0x6f5   :  { %v468_v26 = vshra.s32 %v466_v25, 16  ;;  %v467_v28 = vand.u32 65535, %v466_v25 }
 0x6f7   :  { %v470_v27 = vcvt.s32.f32 %v468_v26  ;;  %v469_v30 = vcvt.s32.f32 %v467_v28 }
 0x6f9   :  { %471 = vmin.xlane.f32.xlu1 %v470_v27 }
 0x786   :  { %v472_v29 = vpop.xlane.xlu1 %471 }
 0x787   :  { %vm473_vm12 = vcmp.eq.f32.partialorder %v470_v27, %v472_v29  ;;  %v478_v32 = vcvt.f32.s32 %v472_v29 }
 0x788   :  { %v474_v31 = vsel %vm473_vm12, %v469_v30, inf }
 0x789   :  { %475 = vmin.xlane.f32.xlu0 %v474_v31  ;;  %v479_v34 = vshll.u32 %v478_v32, 16  ;;  %v764_v32 = vld [vmem:[%s1527_s2] ss:$0 sm:$0xff]  ;;  %s1207_s2 = smov [#allocation11]  }
 0x78a   :  { %s736_s11 = sshll.u32 %s1207_s2, 4  ;;  %s737_s11 = int_to_ptr.vmem [resolvable:$true] %s736_s11 }
 0x78b   :  { %s1119_s14 = scalar_lea.vmem %s737_s11, 128  ;;  %p1124_p5 = scmp.lt.s32.totalorder %s737_s11, %s737_s11 }
 0x78c   :  { %p1120_p4 = scmp.ne.s32.totalorder %s737_s11, %s1119_s14  ;;  %p1125_p6 = scmp.lt.s32.totalorder %s1119_s14, %s1119_s14 }
 0x78e   :  { %p1126_p7 = por %p1125_p6, %p1124_p5 }
 0x790   :  { %p1127_p8 = pnand %p1126_p7, %p1120_p4 }
 0x816   :  { %v476_v33 = vpop.xlane.xlu0 %475 }
 0x817   :  { %v477_v35 = vcvt.f32.s32 %v476_v33 }
 0x819   :  { %v480_v36 = vadd.s32 %v479_v34, %v477_v35 }
 0x81b   :  { %v482_v38 = vsel %vm481_vm13, %v480_v36, %v415_v14  ;;  %vm483_vm14 = vcmp.eq.s32.totalorder %v1372_v20, %v480_v36  ;;  %vm682_vm13 = vcmp.eq.s32.totalorder %v1372_v20, 5 }
 0x81c   :  { %vm789_vm15 = vmpackc.low %vm483_vm14, %vm483_vm14 }
 0x81d   :  { %957 = vmatmul.mubr.msk.bf16.vlgmr.msra.gmra.mrb[8].mxu0 %vm789_vm15, %v1205_v46 }
 0x81e   :  { %981 = vmatpush3.bf16.msra.mxu0 %v1315_v1  ;;  %996 = vmatprep.mubr.msk.bf16.mxu0 %vm1204_vm0, %v1203_v0 }
 0x81f   :  { %982 = vmatprep.subr.bf16.mxu0 %v1203_v0 }
 0x822   :  { %983 = vmatpush3.bf16.msra.mxu0 %v1318_v2  ;;  %v528_v2 = vld [vmem:[#allocation8 + $0x18] sm:$0xff] }
 0x823   :  { %984 = vmatprep.subr.bf16.mxu0 %v1203_v0 }
 0x826   :  { %985 = vmatpush3.bf16.msra.mxu0 %v1322_v3 }
 0x827   :  { %986 = vmatprep.subr.bf16.mxu0 %v1203_v0 }
 0x82a   :  { %987 = vmatpush3.bf16.msra.mxu0 %v1325_v4 }
 0x82b   :  { %988 = vmatprep.subr.bf16.mxu0 %v1203_v0 }
 0x82e   :  { %989 = vmatpush3.bf16.msra.mxu0 %v1330_v5 }
 0x82f   :  { %990 = vmatprep.subr.bf16.mxu0 %v1203_v0 }
 0x832   :  { %991 = vmatpush3.bf16.msra.mxu0 %v1334_v6 }
 0x833   :  { %992 = vmatprep.subr.bf16.mxu0 %v1203_v0 }
 0x836   :  { %993 = vmatpush3.bf16.msra.mxu0 %v1338_v7 }
 0x837   :  { %994 = vmatprep.subr.bf16.mxu0 %v1203_v0 }
 0x83a   :  { %995 = vmatpush3.bf16.msra.mxu0 %v1342_v8 }
 0x8f0   :  { %v521_v1 = vpop.f32.mrb[8].mxu0 }
 0x8f1   :  { %v522_v3 = vadd.f32 %v1368_v11, %v521_v1  ;;  %v958_v4 = vpop.f32.mrb[9].mxu0 }
 0x8f2   :  { %v524_v39 = vpop.f32.mrb[10].mxu0  ;;  %v686_v4 = vshrl.u32 %v82_v19, 7 }
 0x8f3   :  { %v959_v40 = vpop.f32.mrb[11].mxu0  ;;  %v529_v5 = vadd.f32 %v528_v2, %v522_v3 }
 0x8f4   :  { %vm688_vm14 = vcmp.ge.s32.totalorder %v686_v4, 2 }
 0x8f5   :  { %530 = vmax.xlane.f32.xlu1 %v529_v5 }
 0x982   :  { %v531_v41 = vpop.xlane.xlu1 %530 }
 0x983   :  { %vm532_vm0 = vcmp.eq.f32.partialorder %v529_v5, %v531_v41 }
 0x984   :  { %v533_v6 = vsel %vm532_vm0, %v1372_v20, 128 }
 0x985   :  { %v535_v42 = vshra.s32 %v533_v6, 16  ;;  %v534_v7 = vand.u32 65535, %v533_v6 }
 0x987   :  { %v537_v43 = vcvt.s32.f32 %v535_v42  ;;  %v536_v44 = vcvt.s32.f32 %v534_v7  ;;  %v1206_v42 = vmov 0  }
 0x989   :  { %538 = vmin.xlane.f32.xlu0 %v537_v43 }
 0xa16   :  { %v539_v0 = vpop.xlane.xlu0 %538 }
 0xa17   :  { %vm540_vm1 = vcmp.eq.f32.partialorder %v537_v43, %v539_v0  ;;  %v545_v45 = vcvt.f32.s32 %v539_v0 }
 0xa18   :  { %v541_v8 = vsel %vm540_vm1, %v536_v44, inf }
 0xa19   :  { %542 = vmin.xlane.f32.xlu1 %v541_v8  ;;  %v546_v48 = vshll.u32 %v545_v45, 16 }
 0xaa6   :  { %v543_v47 = vpop.xlane.xlu1 %542 }
 0xaa7   :  { %v544_v49 = vcvt.f32.s32 %v543_v47 }
 0xaa9   :  { %v547_v50 = vadd.s32 %v546_v48, %v544_v49  ;;  %v703_v49 = vadd.s32 1, %v1372_v20 }
 0xaab   :  { %v549_v51 = vsel %vm548_vm2, %v547_v50, %v482_v38  ;;  %vm550_vm3 = vcmp.eq.s32.totalorder %v1372_v20, %v547_v50 }
 0xaac   :  { %vm792_vm4 = vmpackc.low %vm550_vm3, %vm550_vm3 }
 0xaad   :  { %977 = vmatmul.mubr.msk.bf16.vlgmr.msra.gmra.mrb[8].mxu1 %vm792_vm4, %v1205_v46 }
 0xb80   :  { %v588_v52 = vpop.f32.mrb[8].mxu1 }
 0xb81   :  { %v589_v54 = vadd.f32 %v1368_v11, %v588_v52  ;;  %v978_v55 = vpop.f32.mrb[9].mxu1 }
 0xb82   :  { %v591_v56 = vpop.f32.mrb[10].mxu1 }
 0xb83   :  { %v979_v57 = vpop.f32.mrb[11].mxu1  ;;  %v596_v58 = vadd.f32 %v595_v53, %v589_v54 }
 0xb85   :  { %597 = vmax.xlane.f32.xlu0 %v596_v58 }
 0xc12   :  { %v598_v59 = vpop.xlane.xlu0 %597 }
 0xc13   :  { %vm599_vm5 = vcmp.eq.f32.partialorder %v596_v58, %v598_v59 }
 0xc14   :  { %v600_v60 = vsel %vm599_vm5, %v1372_v20, 128  ;;  %vm701_vm5 = vcmp.lt.s32.totalorder %v1372_v20, 6 }
 0xc15   :  { %v602_v61 = vshra.s32 %v600_v60, 16  ;;  %v601_v63 = vand.u32 65535, %v600_v60 }
 0xc17   :  { %v604_v62 = vcvt.s32.f32 %v602_v61  ;;  %v603_v10 = vcvt.s32.f32 %v601_v63 }
 0xc19   :  { %605 = vmin.xlane.f32.xlu1 %v604_v62 }
 0xca6   :  { %v606_v9 = vpop.xlane.xlu1 %605 }
 0xca7   :  { %vm607_vm6 = vcmp.eq.f32.partialorder %v604_v62, %v606_v9  ;;  %v612_v13 = vcvt.f32.s32 %v606_v9 }
 0xca8   :  { %v608_v12 = vsel %vm607_vm6, %v603_v10, inf }
 0xca9   :  { %609 = vmin.xlane.f32.xlu0 %v608_v12  ;;  %v613_v15 = vshll.u32 %v612_v13, 16 }
 0xd36   :  { %v610_v14 = vpop.xlane.xlu0 %609 }
 0xd37   :  { %v611_v16 = vcvt.f32.s32 %v610_v14 }
 0xd39   :  { %v614_v17 = vadd.s32 %v613_v15, %v611_v16 }
 0xd3b   :  { %v616_v18 = vsel %vm615_vm7, %v614_v17, %v549_v51  ;;  %vm617_vm8 = vcmp.eq.s32.totalorder %v1372_v20, %v614_v17 }
 0xd3c   :  { %vm795_vm9 = vmpackc.low %vm617_vm8, %vm617_vm8 }
 0xd3d   :  { %997 = vmatmul.mubr.msk.bf16.vlgmr.msra.gmra.mrb[12].mxu0 %vm795_vm9, %v1205_v46  ;;  %v192_v46 = vadd.f32 %v764_v32, %v1401_v37 }
 0xe10   :  { %v655_v21 = vpop.f32.mrb[12].mxu0 }
 0xe11   :  { %v656_v23 = vadd.f32 %v1368_v11, %v655_v21  ;;  %v998_v24 = vpop.f32.mrb[13].mxu0 }
 0xe12   :  { %v658_v25 = vpop.f32.mrb[14].mxu0 }
 0xe13   :  { %v999_v26 = vpop.f32.mrb[15].mxu0  ;;  %v663_v27 = vadd.f32 %v662_v22, %v656_v23 }
 0xe15   :  { %664 = vmax.xlane.f32.xlu1 %v663_v27 }
 0xea2   :  { %v665_v28 = vpop.xlane.xlu1 %664 }
 0xea3   :  { %vm666_vm10 = vcmp.eq.f32.partialorder %v663_v27, %v665_v28 }
 0xea4   :  { %v667_v29 = vsel %vm666_vm10, %v1372_v20, 128 }
 0xea5   :  { %v669_v30 = vshra.s32 %v667_v29, 16  ;;  %v668_v11 = vand.u32 65535, %v667_v29 }
 0xea7   :  { %v671_v31 = vcvt.s32.f32 %v669_v30  ;;  %v670_v34 = vcvt.s32.f32 %v668_v11 }
 0xea9   :  { %672 = vmin.xlane.f32.xlu0 %v671_v31 }
 0xead   :  { %197 = vmax.xlane.f32.xlu0 %v192_v46 }
 0xf36   :  { %v673_v33 = vpop.xlane.xlu0 %672 }
 0xf37   :  { %vm674_vm11 = vcmp.eq.f32.partialorder %v671_v31, %v673_v33  ;;  %v679_v3 = vcvt.f32.s32 %v673_v33 }
 0xf38   :  { %v675_v35 = vsel %vm674_vm11, %v670_v34, inf }
 0xf39   :  { %676 = vmin.xlane.f32.xlu1 %v675_v35  ;;  %v680_v40 = vshll.u32 %v679_v3, 16 }
 0xf3a   :  { %v198_v36 = vpop.xlane.xlu0 %197 }
 0xf3b   :  { %vm199_vm12 = vcmp.eq.f32.partialorder %v192_v46, %v198_v36 }
 0xf3c   :  { %v200_v38 = vsel %vm199_vm12, %v1372_v20, 128 }
 0xf3d   :  { %v202_v1 = vshra.s32 %v200_v38, 16  ;;  %v201_v41 = vand.u32 65535, %v200_v38 }
 0xf3f   :  { %v204_v2 = vcvt.s32.f32 %v202_v1  ;;  %v203_v0 = vcvt.s32.f32 %v201_v41 }
 0xf41   :  { %205 = vmin.xlane.f32.xlu1 %v204_v2 }
 0xfc6   :  { %v677_v39 = vpop.xlane.xlu1 %676 }
 0xfc7   :  { %v678_v37 = vcvt.f32.s32 %v677_v39 }
 0xfc9   :  { %v681_v5 = vadd.s32 %v680_v40, %v678_v37 }
 0xfcb   :  { %v683_v6 = vsel %vm682_vm13, %v681_v5, %v616_v18 }
 0xfcc   :  { %vm687_vm15 = vcmp.eq.s32.totalorder %v683_v6, 1  ;;  %684 = vst [vmem:[#allocation11] sm:$0xff] %v683_v6 }
 0xfcd   :  { %vm689_vm0 = vmor %vm687_vm15, %vm688_vm14 }
 0xfce   :  { %v690_v43 = vsel %vm689_vm0, 1, %v1206_v42  ;;  %v206_v7 = vpop.xlane.xlu1 %205 }
 0xfcf   :  { %v691_v44 = vrot.slane %v690_v43, 4  ;;  %vm207_vm1 = vcmp.eq.f32.partialorder %v204_v2, %v206_v7  ;;  %v212_v54 = vcvt.f32.s32 %v206_v7 }
 0xfd0   :  { %v208_v8 = vsel %vm207_vm1, %v203_v0, inf }
 0xfd1   :  { %209 = vmin.xlane.f32.xlu1 %v208_v8  ;;  %vm692_vm2 = vcmp.lt.s32.totalorder %v690_v43, %v691_v44  ;;  %v213_v56 = vshll.u32 %v212_v54, 16 }
 0xfd2   :  { %v693_v19 = vsel %vm692_vm2, %v690_v43, %v691_v44 }
 0xfd3   :  { %v694_v45 = vrot.slane %v693_v19, 2 }
 0xfd5   :  { %vm695_vm3 = vcmp.lt.s32.totalorder %v693_v19, %v694_v45 }
 0xfd6   :  { %v696_v47 = vsel %vm695_vm3, %v693_v19, %v694_v45 }
 0xfd7   :  { %v697_v48 = vrot.slane %v696_v47, 1 }
 0xfd9   :  { %vm698_vm4 = vcmp.lt.s32.totalorder %v696_v47, %v697_v48 }
 0xfda   :  { %v699_v50 = vsel %vm698_vm4, %v696_v47, %v697_v48 }
 0xfdb   :  { %vm700_vm6 = vcmp.gt.s32.totalorder %v699_v50, 0 }
 0xfdc   :  { %vm702_vm7 = vmand %vm700_vm6, %vm701_vm5 }
 0xfdd   :  { %v704_v51 = vsel %vm702_vm7, %v703_v49, 6 }
 0xfde   :  { %v706_v52 = vshra.s32 %v704_v51, 16  ;;  %v705_v59 = vand.u32 65535, %v704_v51 }
 0xfe0   :  { %v708_v53 = vcvt.s32.f32 %v706_v52  ;;  %v707_v61 = vcvt.s32.f32 %v705_v59 }
 0xfe2   :  { %709 = vmin.xlane.f32.xlu0 %v708_v53 }
0x105e   :  { %v210_v55 = vpop.xlane.xlu1 %209 }
0x105f   :  { %v211_v57 = vcvt.f32.s32 %v210_v55 }
0x1061   :  { %v214_v58 = vadd.s32 %v213_v56, %v211_v57 }
0x1063   :  { %215 = vst [vmem:[#allocation10] sm:$0xff] %v214_v58 }
0x106f   :  { %v710_v60 = vpop.xlane.xlu0 %709 }
0x1070   :  { %vm711_vm8 = vcmp.eq.f32.partialorder %v708_v53, %v710_v60 }
0x1071   :  { %v712_v62 = vsel %vm711_vm8, %v707_v61, inf }
0x1072   :  { %713 = vmin.xlane.f32.xlu0 %v712_v62 }
0x1073   :  { %1130 = shalt.err (!%p1127_p8)
}
0x1074   :  { %s1131_s19 = scalar_lea.hbm %s1532_s7, 128 }
0x1075   :  { %p1132_p9 = scmp.ne.s32.totalorder %s1532_s7, %s1131_s19  ;;  %p1135_p10 = scmp.lt.u32.totalorder %s1131_s19, %s1532_s7 }
0x1077   :  { %p1137_p11 = pnand %p1135_p10, %p1132_p9 }
0x1079   :  { %1140 = shalt.err (!%p1137_p11)
}
0x107a   :  { %739 = dma.vmem_to_hbm [thread:$0]  %s737_s11, 128, %s1532_s7, [#allocation12]  }
0x107b   :  { %s1141_s26 = scalar_lea.vmem %s727_s13, 128  ;;  %p1146_p13 = scmp.lt.s32.totalorder %s727_s13, %s727_s13 }
0x107c   :  { %p1142_p12 = scmp.ne.s32.totalorder %s727_s13, %s1141_s26  ;;  %p1147_p0 = scmp.lt.s32.totalorder %s1141_s26, %s1141_s26 }
0x107e   :  { %p1148_p1 = por %p1147_p0, %p1146_p13 }
0x1080   :  { %p1149_p2 = pnand %p1148_p1, %p1142_p12 }
0x1082   :  { %1152 = shalt.err (!%p1149_p2)
}
0x1083   :  { %s1153_s30 = scalar_lea.hbm %s1531_s6, 128 }
0x1084   :  { %p1154_p3 = scmp.ne.s32.totalorder %s1531_s6, %s1153_s30  ;;  %p1157_p4 = scmp.lt.u32.totalorder %s1153_s30, %s1531_s6 }
0x1086   :  { %p1159_p5 = pnand %p1157_p4, %p1154_p3 }
0x1088   :  { %1162 = shalt.err (!%p1159_p5)
}
0x1089   :  { %729 = dma.vmem_to_hbm [thread:$0]  %s727_s13, 128, %s1531_s6, [#allocation4]   ;;  %v716_v20 = vcvt.f32.s32 %v710_v60 }
0x108a   :  { %s1209_s22 = smov [#allocation13]  }
0x108b   :  { %s746_s5 = sshll.u32 %s1209_s22, 4  ;;  %v717_v9 = vshll.u32 %v716_v20, 16  ;;  %s747_s5 = int_to_ptr.vmem [resolvable:$true] %s746_s5 }
0x108c   :  { %s1163_s9 = scalar_lea.vmem %s747_s5, 16  ;;  %s1167_s4 = scalar_lea.vmem %s747_s5, 32 }
0x108d   :  { %p1164_p6 = scmp.ne.s32.totalorder %s747_s5, %s1163_s9  ;;  %p1168_p7 = scmp.lt.s32.totalorder %s747_s5, %s747_s5 }
0x108e   :  { %p1169_p8 = scmp.lt.s32.totalorder %s1167_s4, %s1163_s9 }
0x1090   :  { %p1170_p9 = por %p1169_p8, %p1168_p7 }
0x1092   :  { %p1171_p10 = pnand %p1170_p9, %p1164_p6 }
0x10ff   :  { %v714_v63 = vpop.xlane.xlu0 %713 }
0x1100   :  { %v715_v10 = vcvt.f32.s32 %v714_v63 }
0x1102   :  { %v718_v12 = vadd.s32 %v717_v9, %v715_v10 }
0x1104   :  { %719 = vst [vmem:[#allocation13] sm:$0x1] %v718_v12 }
0x1105   :  { %1174 = shalt.err (!%p1171_p10)
}
0x1106   :  { %s1175_s6 = scalar_lea.hbm %s1533_s8, 16 }
0x1107   :  { %p1176_p11 = scmp.ne.s32.totalorder %s1533_s8, %s1175_s6  ;;  %p1179_p12 = scmp.lt.u32.totalorder %s1175_s6, %s1533_s8 }
0x1109   :  { %p1181_p13 = pnand %p1179_p12, %p1176_p11 }
0x110b   :  { %1184 = shalt.err (!%p1181_p13)
}
0x110c   :  { %749 = dma.vmem_to_hbm [thread:$0]  %s747_s5, 16, %s1533_s8, [#allocation12]  }
0x110d   :  { %1191 = dma.done.wait [#allocation4], 128  }
0x110e   :  { %1192 = vsyncadd [#allocation4], 4294967168 }
0x110f   :  { %1193 = dma.done.wait [#allocation12], 144  }
0x1110   :  { %1194 = vsyncadd [#allocation12], 4294967152 }
0x1111   :  { %759 = vsyncpa [#allocation3], 1 }
0x1112   :  { %760 = vsyncpa [#allocation6], 1 }
0x1113   :  { %761 = vsyncpa [#allocation9], 1 }
0x1114   :  { %762 = vsyncpa [#allocation4], 1 }
0x1115   :  { %763 = vsyncpa [#allocation12], 1 }

</bundles_post_ra>
